<compile_context>
chip_gen: v6e
topology: v6e:2x2x1
jax: 0.10.0
libtpu: 0.0.40
codegen_flags: <defaults>
</compile_context>

<pallas_src>
import jax
import jax.numpy as jnp
import numpy as np
from jax.experimental import pallas as pl
from jax.experimental.pallas import tpu as pltpu


def _round_up(x, m):
    return -(-x // m) * m


def _pad_to(x, shape):
    pads = [(0, t - s) for s, t in zip(x.shape, shape)]
    if any(p[1] for p in pads):
        x = jnp.pad(x, pads)
    return x


# ---------------------------------------------------------------------------
# Stage 1: seq_fts = X @ W^T   (X = seq flattened to (B*N_pad, K_pad), bf16)
# K is collapsed: the whole (padded) weight stays resident in VMEM.
# ---------------------------------------------------------------------------
def _linear_kernel(x_ref, w_ref, o_ref):
    # x: (tm, K) bf16, w: (F, K) bf16 (torch layout, no wrapper transpose).
    o_ref[...] = jax.lax.dot_general(
        x_ref[...], w_ref[...],
        dimension_numbers=(((1,), (1,)), ((), ())),
        preferred_element_type=jnp.float32,
    ).astype(o_ref.dtype)


def _linear(x2d, w, *, tm):
    M, K = x2d.shape        # already padded: M = B*N_pad, K = K_pad
    F = w.shape[0]          # F_pad
    grid = (M // tm,)
    return pl.pallas_call(
        _linear_kernel,
        out_shape=jax.ShapeDtypeStruct((M, F), jnp.bfloat16),
        grid_spec=pltpu.PrefetchScalarGridSpec(
            num_scalar_prefetch=0,
            grid=grid,
            in_specs=[pl.BlockSpec((tm, K), lambda i: (i, 0)),
                      pl.BlockSpec((F, K), lambda i: (0, 0))],
            out_specs=pl.BlockSpec((tm, F), lambda i: (i, 0)),
        ),
        compiler_params=pltpu.CompilerParams(
            dimension_semantics=("parallel",)),
    )(x2d, w)


# ---------------------------------------------------------------------------
# Stage 2: out[b] = PReLU(graph[b] @ seq_fts[b] + bias)  (fused epilogue).
# Full (padded) feature dim kept resident -> graph streamed from HBM once.
# ---------------------------------------------------------------------------
def _bmm_bias_prelu_kernel(g_ref, f_ref, b_ref, a_ref, o_ref, acc_ref):
    k = pl.program_id(2)

    @pl.when(k == 0)
    def _():
        acc_ref[...] = jnp.zeros_like(acc_ref)

    acc_ref[...] += jnp.dot(g_ref[...], f_ref[...],
                            preferred_element_type=jnp.float32)

    @pl.when(k == pl.num_programs(2) - 1)
    def _():
        y = acc_ref[...] + b_ref[...]          # (tm, F) + (1, F), f32
        a = a_ref[0]                           # PReLU slope (scalar in SMEM)
        o_ref[...] = jnp.where(y > 0, y, a * y).astype(o_ref.dtype)


def _bmm_bias_prelu(graph, seq_fts, bias2d, a_smem, out_dtype, *, tm, tk):
    B, n_pad, _ = graph.shape
    f_pad = seq_fts.shape[-1]
    grid = (B, n_pad // tm, n_pad // tk)       # reduction axis last
    return pl.pallas_call(
        _bmm_bias_prelu_kernel,
        out_shape=jax.ShapeDtypeStruct((B, n_pad, f_pad), out_dtype),
        grid_spec=pltpu.PrefetchScalarGridSpec(
            num_scalar_prefetch=0,
            grid=grid,
            in_specs=[
                # batch dim squeezed (None) -> kernel sees 2-D MXU tiles
                pl.BlockSpec((None, tm, tk), lambda b, i, k: (b, i, k)),
                pl.BlockSpec((None, tk, f_pad), lambda b, i, k: (b, k, 0)),
                pl.BlockSpec((1, f_pad), lambda b, i, k: (0, 0)),
                pl.BlockSpec(memory_space=pltpu.MemorySpace.SMEM),
            ],
            out_specs=pl.BlockSpec((None, tm, f_pad), lambda b, i, k: (b, i, 0)),
            scratch_shapes=[pltpu.VMEM((tm, f_pad), jnp.float32)],
        ),
        compiler_params=pltpu.CompilerParams(
            dimension_semantics=("parallel", "parallel", "arbitrary")),
    )(graph, seq_fts, bias2d, a_smem)


def gcn_forward(graph, seq, weight, bias, prelu_a):
    """GCN.forward(graph, seq) for dense batched inputs.

    graph:  (B, N, N)    dense propagation matrix
    seq:    (B, N, in_ft)
    weight: (out_ft, in_ft)   (torch nn.Linear layout)
    bias:   (out_ft,)
    prelu_a: scalar PReLU slope
    """
    B, N, in_ft = seq.shape
    out_ft = weight.shape[0]
    out_dtype = seq.dtype

    # ---- tile / padding choices (lane dims -> >=128, sublane -> >=16) ------
    if N >= 1024:
        tn = 256
    elif N >= 128:
        tn = 128
    else:
        tn = _round_up(N, 16)
    n_pad = _round_up(N, tn)
    k_pad = _round_up(in_ft, 128)
    f_pad = _round_up(out_ft, 128)
    # NOTE: f_pad is kept fully resident in stage 2 (fine up to a few thousand
    # features given the ~MiB-scale VMEM working set); very large out_ft would
    # need an extra feature-tiling axis.

    # ---- zero-pad + bf16 cast (padding contributes exact zeros) ------------
    graph_p = _pad_to(graph, (B, n_pad, n_pad)).astype(jnp.bfloat16)
    seq_p = _pad_to(seq, (B, n_pad, k_pad)).astype(jnp.bfloat16)
    w_p = _pad_to(weight, (f_pad, k_pad)).astype(jnp.bfloat16)
    bias_p = _pad_to(bias.reshape(1, out_ft), (1, f_pad)).astype(jnp.float32)
    a_smem = jnp.asarray(prelu_a, jnp.float32).reshape(1)

    # ---- stage 1: linear (batch folded into sublane axis) ------------------
    m_pad = B * n_pad
    tm_lin = next((c for c in (512, 256, 128, 64, 32, 16) if m_pad % c == 0),
                  m_pad)
    seq_fts = _linear(seq_p.reshape(m_pad, k_pad), w_p, tm=tm_lin)
    seq_fts = seq_fts.reshape(B, n_pad, f_pad)          # bf16 intermediate

    # ---- stage 2: bmm + bias + PReLU ---------------------------------------
    out = _bmm_bias_prelu(graph_p, seq_fts, bias_p, a_smem, out_dtype,
                          tm=tn, tk=tn)
    return out[:, :N, :out_ft]


if __name__ == "__main__":
    key = jax.random.PRNGKey(0)
    kg, ks, kw, kb = jax.random.split(key, 4)

    B, N, in_ft, out_ft = 2, 16, 32, 32
    graph = jax.random.uniform(kg, (B, N, N), dtype=jnp.float32)
    graph = graph / jnp.sum(graph, axis=-1, keepdims=True)  # row-normalized adj
    seq = jax.random.normal(ks, (B, N, in_ft), dtype=jnp.float32)
    weight = jax.random.normal(kw, (out_ft, in_ft), dtype=jnp.float32) * 0.1
    bias = jax.random.normal(kb, (out_ft,), dtype=jnp.float32) * 0.1
    prelu_a = 0.25  # torch nn.PReLU() default init

    out = jax.block_until_ready(gcn_forward(graph, seq, weight, bias, prelu_a))

    # Pure-JAX f32 reference of the PyTorch forward (dense path).
    ref_fts = jnp.einsum("bni,oi->bno", seq, weight)
    ref = jnp.einsum("bnm,bmo->bno", graph, ref_fts) + bias
    ref = jnp.where(ref > 0, ref, prelu_a * ref)

    assert out.shape == (B, N, out_ft)
    # bf16 matmul operands (f32 accumulation) -> loosened tolerance vs f32 ref.
    np.testing.assert_allclose(np.asarray(out), np.asarray(ref),
                               rtol=2e-2, atol=2e-2)
    print("KERNEL_OK")
</pallas_src>

<mosaic_0001>
module attributes {stable_mosaic.version = 11 : i64} {
  func.func @_linear_kernel(%arg0: i32, %arg1: memref<32x128xbf16, #tpu.memory_space<vmem>>, %arg2: memref<128x128xbf16, #tpu.memory_space<vmem>>, %arg3: memref<32x128xbf16, #tpu.memory_space<vmem>>) attributes {dimension_semantics = [#tpu.dimension_semantics<parallel>], iteration_bounds = array<i64: 1>, scalar_prefetch = 0 : i64, scratch_operands = 0 : i64, tpu.core_type = #tpu.core_type<tc>, window_params = [{transform_indices = @transform_0, window_bounds = array<i64: 32, 128>}, {pipeline_mode = #tpu.pipeline_mode<synchronous>, transform_indices = @transform_1, window_bounds = array<i64: 128, 128>}, {transform_indices = @transform_2, window_bounds = array<i64: 32, 128>}]} {
    %c0 = arith.constant 0 : index
    %c0_0 = arith.constant 0 : index
    %0 = vector.load %arg1[%c0, %c0_0] : memref<32x128xbf16, #tpu.memory_space<vmem>>, vector<32x128xbf16>
    %c0_1 = arith.constant 0 : index
    %c0_2 = arith.constant 0 : index
    %1 = vector.load %arg2[%c0_1, %c0_2] : memref<128x128xbf16, #tpu.memory_space<vmem>>, vector<128x128xbf16>
    %cst = arith.constant dense<0.000000e+00> : vector<32x128xf32>
    %2 = tpu.matmul %0, %1, %cst {dimension_numbers = #tpu.dot_dimension_numbers<[1], [1], [0], [0], [0, 0, 1, 0], [], []>} : vector<32x128xbf16>, vector<128x128xbf16>, vector<32x128xf32> -> vector<32x128xf32>
    %3 = arith.truncf %2 : vector<32x128xf32> to vector<32x128xbf16>
    %c0_3 = arith.constant 0 : index
    %c0_4 = arith.constant 0 : index
    %4 = vector.load %arg3[%c0_3, %c0_4] : memref<32x128xbf16, #tpu.memory_space<vmem>>, vector<32x128xbf16>
    tpu.vector_store %arg3[%c0_3, %c0_4], %3 {strides = array<i32>} : memref<32x128xbf16, #tpu.memory_space<vmem>>, vector<32x128xbf16>,
    return
  }
  func.func @transform_0(%arg0: i32) -> (i32, i32) {
    %c0_i32 = arith.constant 0 : i32
    %c0_i32_0 = arith.constant 0 : i32
    return %arg0, %c0_i32 : i32, i32
  }
  func.func @transform_1(%arg0: i32) -> (i32, i32) {
    %c0_i32 = arith.constant 0 : i32
    %c0_i32_0 = arith.constant 0 : i32
    %c0_i32_1 = arith.constant 0 : i32
    return %c0_i32, %c0_i32_0 : i32, i32
  }
  func.func @transform_2(%arg0: i32) -> (i32, i32) {
    %c0_i32 = arith.constant 0 : i32
    %c0_i32_0 = arith.constant 0 : i32
    return %arg0, %c0_i32 : i32, i32
  }
}

</mosaic_0001>

<bundles_post_ra>
// kernel: tpu_custom_call.1
= control target key start
LH: loop header
LB: loop body
LE: loop exit
PB: predicated region body
PF: predicated region fallthrough
CT: control target
= control target key end

     0   :  { %7 = vsyncpa [#allocation3], 0  ;;  %s386_s0 = inlined_call_operand.hbm [shape: bf16[32,128], index: 0, kind: input, shape index: {}]   ;;  %s387_s1 = inlined_call_operand.hbm [shape: bf16[128,128], index: 1, kind: input, shape index: {}]   ;;  %s388_s2 = inlined_call_operand.hbm [shape: bf16[32,128], index: 2, kind: output, shape index: {}]  }
   0x1   :  { %8 = vsyncpa [#allocation6], 0 }
   0x2   :  { %9 = vsyncpa [#allocation4], 0  ;;  %s348_s9 = smov [#allocation2]  }
   0x3   :  { %s15_s10 = sshll.u32 %s348_s9, 4  ;;  %s16_s10 = int_to_ptr.vmem [resolvable:$true] %s15_s10 }
   0x4   :  { %s290_s11 = scalar_lea.vmem %s16_s10, 256  ;;  %p295_p1 = scmp.lt.s32.totalorder %s16_s10, %s16_s10 }
   0x5   :  { %p291_p0 = scmp.ne.s32.totalorder %s16_s10, %s290_s11  ;;  %p296_p2 = scmp.lt.s32.totalorder %s290_s11, %s290_s11 }
   0x7   :  { %p297_p3 = por %p296_p2, %p295_p1 }
   0x9   :  { %p298_p4 = pnand %p297_p3, %p291_p0 }
   0xb   :  { %301 = shalt.err (!%p298_p4)
}
   0xc   :  { %s349_s12 = smov 64   ;;  %s350_s13 = smov 4  }
   0xd   :  { %21 = dma.hbm_to_vmem [thread:$0]  %s386_s0, 256, %s16_s10, [#allocation3], %s349_s12, %s349_s12, %s350_s13  }
   0xe   :  { %s351_s16 = smov [#allocation5]  }
   0xf   :  { %s27_s17 = sshll.u32 %s351_s16, 4  ;;  %s28_s17 = int_to_ptr.vmem [resolvable:$true] %s27_s17 }
  0x10   :  { %s310_s18 = scalar_lea.vmem %s28_s17, 1024  ;;  %p315_p6 = scmp.lt.s32.totalorder %s28_s17, %s28_s17 }
  0x11   :  { %p311_p5 = scmp.ne.s32.totalorder %s28_s17, %s310_s18  ;;  %p316_p7 = scmp.lt.s32.totalorder %s310_s18, %s310_s18 }
  0x13   :  { %p317_p8 = por %p316_p7, %p315_p6 }
  0x15   :  { %p318_p9 = pnand %p317_p8, %p311_p5 }
  0x17   :  { %321 = shalt.err (!%p318_p9)
}
  0x18   :  { %33 = dma.hbm_to_vmem [thread:$0]  %s387_s1, 1024, %s28_s17, [#allocation6], %s349_s12, %s349_s12, %s350_s13  }
  0x19   :  { %342 = dma.done.wait [#allocation3], 256  }
  0x1a   :  { %343 = vsyncadd [#allocation3], 4294967040 }
  0x1b   :  { %344 = dma.done.wait [#allocation6], 1024  }
  0x1c   :  { %345 = vsyncadd [#allocation6], 4294966272  ;;  %v272_v0 = vld [vmem:[#allocation5 + $0x38] sm:$0xff]   ;;  %v273_v1 = vld [vmem:[#allocation5 + $0x30] sm:$0xff]   ;;  %s352_s0 = smov [#allocation7]  }
  0x1d   :  { %247 = vmatprep.subr.bf16.mxu0 %v272_v0  ;;  %v274_v2 = vld [vmem:[#allocation5 + $0x28] sm:$0xff]   ;;  %v280_v3 = vld [vmem:[#allocation2] sm:$0xff]   ;;  %v275_v4 = vld [vmem:[#allocation5 + $0x20] sm:$0xff]   ;;  %s195_s1 = sshll.u32 %s352_s0, 4  ;;  %s196_s1 = int_to_ptr.vmem [resolvable:$true] %s195_s1 }
  0x1e   :  { %248 = vmatpush3.bf16.xpose.msra.mxu0 %v272_v0  ;;  %263 = vmatprep.mubr.bf16.mxu0 %v280_v3  ;;  %v276_v5 = vld [vmem:[#allocation5 + $0x18] sm:$0xff]   ;;  %v277_v6 = vld [vmem:[#allocation5 + $0x10] sm:$0xff]   ;;  %v278_v7 = vld [vmem:[#allocation5 + $0x8] sm:$0xff]   ;;  %s322_s21 = scalar_lea.vmem %s196_s1, 256  ;;  %p327_p11 = scmp.lt.s32.totalorder %s196_s1, %s196_s1 }
  0x1f   :  { %249 = vmatprep.subr.bf16.mxu0 %v273_v1  ;;  %v279_v8 = vld [vmem:[#allocation5] sm:$0xff]   ;;  %v281_v9 = vld [vmem:[#allocation2 + $0x8] sm:$0xff]   ;;  %p323_p10 = scmp.ne.s32.totalorder %s196_s1, %s322_s21  ;;  %p328_p12 = scmp.lt.s32.totalorder %s322_s21, %s322_s21 }
  0x21   :  { %p329_p13 = por %p328_p12, %p327_p11 }
  0x23   :  { %p330_p0 = pnand %p329_p13, %p323_p10 }
  0x26   :  { %250 = vmatpush3.bf16.xpose.msra.mxu0 %v273_v1 }
  0x27   :  { %251 = vmatprep.subr.bf16.mxu0 %v274_v2 }
  0x2e   :  { %252 = vmatpush3.bf16.xpose.msra.mxu0 %v274_v2 }
  0x2f   :  { %253 = vmatprep.subr.bf16.mxu0 %v275_v4 }
  0x36   :  { %254 = vmatpush3.bf16.xpose.msra.mxu0 %v275_v4 }
  0x37   :  { %255 = vmatprep.subr.bf16.mxu0 %v276_v5 }
  0x3e   :  { %256 = vmatpush3.bf16.xpose.msra.mxu0 %v276_v5 }
  0x3f   :  { %257 = vmatprep.subr.bf16.mxu0 %v277_v6 }
  0x46   :  { %258 = vmatpush3.bf16.xpose.msra.mxu0 %v277_v6 }
  0x47   :  { %259 = vmatprep.subr.bf16.mxu0 %v278_v7 }
  0x4e   :  { %260 = vmatpush3.bf16.xpose.msra.mxu0 %v278_v7 }
  0x4f   :  { %261 = vmatprep.subr.bf16.mxu0 %v279_v8 }
  0x56   :  { %262 = vmatpush3.bf16.xpose.msra.mxu0 %v279_v8 }
  0x5d   :  { %264 = vmatmul.mubr.bf16.vlgmr.msra.gmra.mxu0 %v281_v9 }
 0x11d   :  { %v265_v10 = vpop.f32.mrf.mxu0 }
 0x11f   :  { %v155_v11 = vpop.f32.mrf.mxu0 }
 0x121   :  { %v266_v12 = vpop.f32.mrf.mxu0 }
 0x122   :  { %v234_v13 = vpack.c.bf16 %v266_v12, %v265_v10 }
 0x123   :  { %v158_v14 = vpop.f32.mrf.mxu0 }
 0x124   :  { %236 = vst [vmem:[#allocation7 + $0x8] sm:$0xff] %v234_v13   ;;  %v229_v15 = vpack.c.bf16 %v158_v14, %v155_v11 }
 0x126   :  { %230 = vst [vmem:[#allocation7] sm:$0xff] %v229_v15  }
 0x127   :  { %333 = shalt.err (!%p330_p0)
}
 0x128   :  { %201 = dma.vmem_to_hbm [thread:$0]  %s196_s1, 256, %s388_s2, [#allocation4], %s349_s12, %s349_s12, %s350_s13  }
 0x129   :  { %346 = dma.done.wait [#allocation4], 256  }
 0x12a   :  { %347 = vsyncadd [#allocation4], 4294967040 }
 0x12b   :  { %205 = vsyncpa [#allocation3], 1 }
 0x12c   :  { %206 = vsyncpa [#allocation6], 1 }
 0x12d   :  { %207 = vsyncpa [#allocation4], 1 }

</bundles_post_ra>
